<compile_context>
chip_gen: v7x
topology: tpu7x:2x2x1
jax: 0.10.0
libtpu: 0.0.40
codegen_flags: <defaults>
</compile_context>

<pallas_src>
import functools

import jax
import jax.numpy as jnp
from jax.experimental import pallas as pl
from jax.experimental.pallas import tpu as pltpu


def _round_up(x, m):
    return ((x + m - 1) // m) * m


def _lstm_chunk_kernel(state0_ref, enc_ref, w_gates_ref, b_gates_ref,
                       h_seq_ref, state_ref, h_sc, c_sc, *, T, Tc, C):
    """Run Tc LSTM-cell steps of one batch block per grid point.

    Grid = (batch_blocks, time_chunks).  The recurrent carry (h, c) lives in
    VMEM scratch and persists across the (sequential, "arbitrary") time axis;
    the packed [h | c] state output is written once at the last time chunk.
    Encoder and logits head have no time dependence and are hoisted out of the
    kernel, so the serial chain per step is gate-matmul + EUP + VPU only.
    """
    tc = pl.program_id(1)
    n_tc = pl.num_programs(1)
    Bb = h_sc.shape[0]
    CP = h_seq_ref.shape[-1]

    # Load the initial carry at the first time chunk of each batch block.
    # Store layout [B, 2, 1, C] is row-major contiguous with [B, 2C] where
    # dim-1 index 0 = h and index 1 = c (RLlib [h, c] ordering).
    @pl.when(tc == 0)
    def _init():
        h_sc[...] = state0_ref[:, :C]
        c_sc[...] = state0_ref[:, C:]

    # ---- loop invariants hoisted out of the step loop (JAX does not CSE
    # broadcast_in_dim / iota across loop iterations) ----
    w_g = w_gates_ref[...]                                        # bf16 MXU operand
    b_g = jnp.broadcast_to(b_gates_ref[...], (Bb, 4 * C))         # f32
    lane = jax.lax.broadcasted_iota(jnp.int32, (Bb, 4 * C), 1)
    is_g = jnp.logical_and(lane >= 2 * C, lane < 3 * C)           # g-gate -> tanh
    if CP > C:
        pad_tail = jnp.zeros((Bb, CP - C), jnp.float32)           # lane-dense rows
    chunk_base = tc * Tc
    tail_padded = (T % Tc) != 0            # static python bool (shapes static)

    def step(t, carry):
        h = h_sc[...]                                             # [Bb, C] f32
        c = c_sc[...]
        enc_t = enc_ref[t]                                        # [Bb, H] bf16

        # Fused LSTM gate matmul: [enc | h] @ [[W_ih]; [W_hh]] -> one MXU pass,
        # f32 accumulation.
        cat = jnp.concatenate([enc_t, h.astype(jnp.bfloat16)], axis=-1)
        gates = jnp.dot(cat, w_g, preferred_element_type=jnp.float32) + b_g

        # One sigmoid pass + one tanh pass on the EUP + static lane select.
        # Torch LSTMCell gate (column-block) order: i, f, g, o.
        act = jnp.where(is_g, jnp.tanh(gates), jax.nn.sigmoid(gates))
        i_g = act[:, 0 * C:1 * C]
        f_g = act[:, 1 * C:2 * C]
        g_g = act[:, 2 * C:3 * C]
        o_g = act[:, 3 * C:4 * C]

        c_new = f_g * c + i_g * g_g
        h_new = o_g * jnp.tanh(c_new)

        if tail_padded:
            # Steps past the true sequence length (time padding of the last
            # chunk) must not advance the carry; their h rows are garbage and
            # are sliced off host-side.
            valid = (chunk_base + t) < T
            c_new = jnp.where(valid, c_new, c)
            h_new = jnp.where(valid, h_new, h)

        h_sc[...] = h_new
        c_sc[...] = c_new
        # Lane-dense per-step output: pad h to CP=128 lanes (one full f32 vreg
        # per store); W_out rows >= C are zero, so the pad is free downstream.
        if CP > C:
            h_seq_ref[t] = jnp.concatenate([h_new, pad_tail], axis=-1)
        else:
            h_seq_ref[t] = h_new
        return carry

    jax.lax.fori_loop(0, Tc, step, 0, unroll=(Tc <= 16))

    # Write the packed [h | c] state back once, at the very last time chunk.
    @pl.when(tc == n_tc - 1)
    def _finish():
        state_ref[...] = jnp.concatenate([h_sc[...], c_sc[...]], axis=-1)


def _run_lstm_chunks(state0, enc_seq, w_gates, b_gates, *, T, Tc, NB):
    """state0: [Bp, 2C] f32, enc_seq: [T_pad, Bp, H] bf16
    -> (h_seq [T_pad, Bp, CP] f32, final packed state [Bp, 2C] f32)."""
    T_pad, Bp, H = enc_seq.shape
    twoC = state0.shape[-1]
    C = twoC // 2
    CP = _round_up(C, 128)                  # lane-dense per-step output slab
    Bb = Bp // NB
    NTc = T_pad // Tc

    kernel = functools.partial(_lstm_chunk_kernel, T=T, Tc=Tc, C=C)
    const = lambda nb, tc: (0, 0)           # weights stay VMEM-resident

    # VMEM budget (double-buffered enc chunk + h chunk + weights) is well under
    # even v5e's 16 MiB default scoped VMEM at these sizes; set
    # vmem_limit_bytes explicitly in CompilerParams if Tc / H / C are scaled up
    # (v7x has only 64 MiB physical VMEM).
    return pl.pallas_call(
        kernel,
        grid=(NB, NTc),
        out_shape=(
            jax.ShapeDtypeStruct((T_pad, Bp, CP), jnp.float32),   # h stream
            jax.ShapeDtypeStruct((Bp, twoC), jnp.float32),        # final [h | c]
        ),
        in_specs=[
            pl.BlockSpec((Bb, twoC), lambda nb, tc: (nb, 0)),       # initial state
            pl.BlockSpec((Tc, Bb, H), lambda nb, tc: (tc, nb, 0)),  # enc chunk
            pl.BlockSpec(w_gates.shape, const),
            pl.BlockSpec(b_gates.shape, const),
        ],
        out_specs=(
            pl.BlockSpec((Tc, Bb, CP), lambda nb, tc: (tc, nb, 0)),  # h chunk
            pl.BlockSpec((Bb, twoC), lambda nb, tc: (nb, 0)),        # carried state
        ),
        scratch_shapes=[pltpu.VMEM((Bb, C), jnp.float32),            # h carry
                        pltpu.VMEM((Bb, C), jnp.float32)],           # c carry
        compiler_params=pltpu.CompilerParams(
            # Batch blocks are independent recurrent chains -> "parallel"
            # (uses the 2nd TensorCore on v7x when NB >= 2); time is serial.
            dimension_semantics=("parallel", "arbitrary")),
    )(state0, enc_seq, w_gates, b_gates)


def _reference_rollout(params, obs_seq, state_store, C, A):
    """Pure-JAX (XLA) reference mirroring the kernel math (bf16 MXU operands,
    f32 accumulation / activations)."""
    T, B, D = obs_seq.shape
    enc = jnp.dot(obs_seq.reshape(T * B, D).astype(jnp.bfloat16), params["w_enc"],
                  preferred_element_type=jnp.float32) + params["b_enc"]
    enc = jnp.maximum(enc, 0.0).astype(jnp.bfloat16).reshape(T, B, -1)

    h0 = state_store[:, 0, 0, :].astype(jnp.float32)
    c0 = state_store[:, 1, 0, :].astype(jnp.float32)
    w_g, b_g = params["w_gates"], params["b_gates"]

    def step(carry, e_t):
        h, c = carry
        cat = jnp.concatenate([e_t, h.astype(jnp.bfloat16)], axis=-1)
        g = jnp.dot(cat, w_g, preferred_element_type=jnp.float32) + b_g
        i_g = jax.nn.sigmoid(g[:, 0 * C:1 * C])
        f_g = jax.nn.sigmoid(g[:, 1 * C:2 * C])
        g_g = jnp.tanh(g[:, 2 * C:3 * C])
        o_g = jax.nn.sigmoid(g[:, 3 * C:4 * C])
        c_n = f_g * c + i_g * g_g
        h_n = o_g * jnp.tanh(c_n)
        return (h_n, c_n), h_n

    (h_f, c_f), h_seq = jax.lax.scan(step, (h0, c0), enc)
    logits = jnp.dot(h_seq.reshape(T * B, C).astype(jnp.bfloat16),
                     params["w_out"][:C], preferred_element_type=jnp.float32)
    logits = (logits + params["b_out"]).reshape(T, B, A)
    new_store = jnp.stack([h_f, c_f], axis=1)[:, :, None, :]
    return logits, new_store


class RayRecurrentModelWrapperPallas:
    """JAX/Pallas port of RayRecurrentModelWrapper (RLlib FC+LSTM policy).

    The recurrent cell runs in a single chunked Pallas kernel; the encoder and
    logits head (no time dependence) run as batched XLA matmuls around it.
    The jitted step/rollout functions are pure; only `_last_state` mirrors the
    torch wrapper's mutable field.
    """

    def __init__(self, obs_dim, hidden_size, lstm_cell_size, num_actions, key,
                 time_chunk=128):
        self.obs_dim = obs_dim
        self.hidden_size = hidden_size
        self.lstm_cell_size = lstm_cell_size
        self.num_actions = num_actions
        self.time_chunk = int(time_chunk)
        self._last_state = None

        C, H, A, D = lstm_cell_size, hidden_size, num_actions, obs_dim
        CP = _round_up(C, 128)               # lane-padded hidden slab (kernel output)
        ks = jax.random.split(key, 4)
        s = 0.1
        w_ih = s * jax.random.normal(ks[0], (H, 4 * C), jnp.float32)
        w_hh = s * jax.random.normal(ks[1], (C, 4 * C), jnp.float32)
        w_out = jnp.zeros((CP, A), jnp.float32).at[:C].set(
            s * jax.random.normal(ks[2], (C, A), jnp.float32))

        self.params = {
            # Weights pre-transposed to [in, out]; bf16 MXU operands, f32 accumulate.
            "w_enc": (s * jax.random.normal(ks[3], (D, H), jnp.float32)
                      ).astype(jnp.bfloat16),
            "b_enc": jnp.zeros((1, H), jnp.float32),
            # Fused gate weight [[W_ih]; [W_hh]], gate column order i,f,g,o.
            # NOTE: torch checkpoint import: transpose W_ih/W_hh from [4C,in] to
            # [in,4C] keeping the i,f,g,o column chunks, and set
            # b_gates = b_ih + b_hh.
            "w_gates": jnp.concatenate([w_ih, w_hh], axis=0).astype(jnp.bfloat16),
            "b_gates": jnp.zeros((1, 4 * C), jnp.float32),
            # Logits head weight padded along K to CP (rows >= C are zero).
            "w_out": w_out.astype(jnp.bfloat16),
            "b_out": jnp.zeros((1, A), jnp.float32),
        }

        time_chunk = self.time_chunk

        def rollout_fn(params, obs_seq, state_store):
            T, B, _ = obs_seq.shape                 # static under jit
            # Batch padded to full sublanes; >= 16 rows are split into 2 blocks
            # so the "parallel" grid axis can use the 2nd TensorCore on v7x.
            Bp = _round_up(B, 16) if B > 8 else _round_up(B, 8)
            NB = 2 if Bp >= 16 else 1
            Tc = min(T, time_chunk)
            T_pad = _round_up(T, Tc)

            # ---- encoder hoisted off the recurrent path: one batched matmul ----
            enc = jnp.dot(obs_seq.reshape(T * B, D).astype(jnp.bfloat16),
                          params["w_enc"], preferred_element_type=jnp.float32)
            enc = jnp.maximum(enc + params["b_enc"], 0.0)
            enc = enc.astype(jnp.bfloat16).reshape(T, B, H)   # bf16 stream -> half DMA
            enc = jnp.pad(enc, ((0, T_pad - T), (0, Bp - B), (0, 0)))

            # [B,2,1,C] is row-major contiguous with [B, 2C] = per-row [h | c]
            # (dim-1: 0 = h, 1 = c), so the state plumbing is a free reshape.
            st = jnp.pad(state_store.reshape(B, 2 * C).astype(jnp.float32),
                         ((0, Bp - B), (0, 0)))

            h_seq, state_p = _run_lstm_chunks(st, enc, params["w_gates"],
                                              params["b_gates"],
                                              T=T, Tc=Tc, NB=NB)

            # ---- logits head deferred off the recurrent path: one batched matmul.
            # h_seq lanes >= C are zero and the matching w_out rows are zero.
            logits = jnp.dot(h_seq.reshape(T_pad * Bp, CP).astype(jnp.bfloat16),
                             params["w_out"], preferred_element_type=jnp.float32)
            logits = (logits + params["b_out"]).reshape(T_pad, Bp, A)
            logits = logits[:T, :B]                     # drop time/batch padding
            new_store = state_p[:B].reshape(B, 2, 1, C)  # free reshape
            return logits, new_store

        def step_fn(params, obs_flat, state_store):
            # T=1 path: launch/DMA-bound by construction; batch env steps into
            # rollout() when single-step latency matters.
            logits_seq, new_store = rollout_fn(params, obs_flat[None], state_store)
            return logits_seq[0], new_store

        self._jit_step = jax.jit(step_fn)
        self._jit_rollout = jax.jit(rollout_fn)

    # ---- forward (seq_lens == 1, exactly one LSTM step per batch element) ----
    def forward(self, obs_flat, state):
        """obs_flat [B, obs_dim], state [B, 2, 1, C] -> logits [B, num_actions]."""
        logits, new_store = self._jit_step(self.params, obs_flat, state)
        self._last_state = new_store
        return logits

    # ---- fused multi-step rollout: all T policy steps in ONE pallas_call ----
    def rollout(self, obs_seq, state):
        """obs_seq [T, B, obs_dim], state [B, 2, 1, C] -> logits [T, B, num_actions]."""
        logits_seq, new_store = self._jit_rollout(self.params, obs_seq, state)
        self._last_state = new_store
        return logits_seq

    # ---- state API (mirrors RecurrentModel / RayRecurrentModelWrapper) ----
    def initial_state(self, batch_size):
        return jnp.zeros((batch_size, 2, 1, self.lstm_cell_size), jnp.float32)

    def last_output_state(self):
        if self._last_state is None:
            raise RuntimeError(
                "Trying to get last output hidden state without calling forward() first.")
        return self._last_state

    # Kept for API parity; not used on the hot path (the conversion is a free
    # row-major reshape handled around the kernel).
    def reshape_to_torch(self, state):
        return jnp.squeeze(jnp.transpose(state, (1, 2, 0, 3)), axis=1)

    def reshape_to_store(self, state):
        return jnp.transpose(state[:, None, :, :], (2, 0, 1, 3))


if __name__ == "__main__":
    # Small shapes: obs space = Box(4, 4) -> obs_flat dim 16
    B, OBS_DIM, HIDDEN, CELL, ACTIONS = 2, 16, 32, 32, 8
    T = 8

    key = jax.random.PRNGKey(0)
    k_obs, k_seq, k_long, k_params = jax.random.split(key, 4)

    model = RayRecurrentModelWrapperPallas(OBS_DIM, HIDDEN, CELL, ACTIONS,
                                           k_params, time_chunk=64)

    obs_flat = jax.random.normal(k_obs, (B, OBS_DIM), jnp.float32)
    state = model.initial_state(B)                        # [B, 2, 1, CELL]

    # Single policy step (grid (1,1), Tc=1).
    logits = model.forward(obs_flat, state)
    jax.block_until_ready(logits)
    last = model.last_output_state()
    jax.block_until_ready(last)
    assert logits.shape == (B, ACTIONS)
    assert last.shape == (B, 2, 1, CELL)

    # Fused T-step rollout (single chunk; weights + carry stay VMEM-resident).
    obs_rest = jax.random.normal(k_seq, (T - 1, B, OBS_DIM), jnp.float32)
    obs_seq = jnp.concatenate([obs_flat[None], obs_rest], axis=0)
    logits_seq = model.rollout(obs_seq, state)
    jax.block_until_ready(logits_seq)
    assert logits_seq.shape == (T, B, ACTIONS)
    assert model.last_output_state().shape == (B, 2, 1, CELL)
    # Step 0 of the fused rollout must match the single-step forward.
    assert jnp.allclose(logits_seq[0], logits, rtol=1e-4, atol=1e-5)

    # Parity against a pure-JAX reference (same bf16-operand / f32-accum math).
    ref_logits, ref_state = _reference_rollout(model.params, obs_seq, state,
                                               CELL, ACTIONS)
    assert jnp.allclose(logits_seq, ref_logits, rtol=1e-2, atol=1e-3), \
        float(jnp.max(jnp.abs(logits_seq - ref_logits)))
    assert jnp.allclose(model.last_output_state(), ref_state, rtol=1e-2, atol=1e-3)

    # Longer batched rollout: exercises multi-chunk time blocking, the
    # tail-step mask (T=100, Tc=64), batch padding (20 -> 32) and the
    # 2-block "parallel" batch axis (2nd TensorCore on v7x).
    T2, B2 = 100, 20
    obs_long = jax.random.normal(k_long, (T2, B2, OBS_DIM), jnp.float32)
    state2 = model.initial_state(B2)
    logits_long = model.rollout(obs_long, state2)
    jax.block_until_ready(logits_long)
    assert logits_long.shape == (T2, B2, ACTIONS)
    ref_logits2, ref_state2 = _reference_rollout(model.params, obs_long, state2,
                                                 CELL, ACTIONS)
    assert jnp.allclose(logits_long, ref_logits2, rtol=1e-2, atol=1e-3), \
        float(jnp.max(jnp.abs(logits_long - ref_logits2)))
    assert jnp.allclose(model.last_output_state(), ref_state2, rtol=1e-2, atol=1e-3)

    print("KERNEL_OK")
</pallas_src>

<mosaic_0001>
module attributes {stable_mosaic.version = 11 : i64} {
  func.func @_lstm_chunk_kernel(%arg0: i32, %arg1: i32, %arg2: memref<8x64xf32, #tpu.memory_space<vmem>>, %arg3: memref<1x8x32xbf16, #tpu.memory_space<vmem>>, %arg4: memref<64x128xbf16, #tpu.memory_space<vmem>>, %arg5: memref<1x128xf32, #tpu.memory_space<vmem>>, %arg6: memref<1x8x128xf32, #tpu.memory_space<vmem>>, %arg7: memref<8x64xf32, #tpu.memory_space<vmem>>, %arg8: memref<8x32xf32, #tpu.memory_space<vmem>>, %arg9: memref<8x32xf32, #tpu.memory_space<vmem>>) attributes {dimension_semantics = [#tpu.dimension_semantics<parallel>, #tpu.dimension_semantics<arbitrary>], iteration_bounds = array<i64: 1, 1>, scalar_prefetch = 0 : i64, scratch_operands = 2 : i64, tpu.core_type = #tpu.core_type<tc>, window_params = [{transform_indices = @transform_0, window_bounds = array<i64: 8, 64>}, {transform_indices = @transform_1, window_bounds = array<i64: 1, 8, 32>}, {pipeline_mode = #tpu.pipeline_mode<synchronous>, transform_indices = @transform_2, window_bounds = array<i64: 64, 128>}, {pipeline_mode = #tpu.pipeline_mode<synchronous>, transform_indices = @transform_3, window_bounds = array<i64: 1, 128>}, {transform_indices = @transform_4, window_bounds = array<i64: 1, 8, 128>}, {transform_indices = @transform_5, window_bounds = array<i64: 8, 64>}]} {
    %c0_i32 = arith.constant 0 : i32
    %0 = arith.cmpi eq, %arg1, %c0_i32 : i32
    %1 = arith.extui %0 : i1 to i32
    %c0_i32_0 = arith.constant 0 : i32
    %2 = arith.cmpi ne, %1, %c0_i32_0 : i32
    scf.if %2 {
      %c0_21 = arith.constant 0 : index
      %c0_22 = arith.constant 0 : index
      %49 = vector.load %arg2[%c0_21, %c0_22] : memref<8x64xf32, #tpu.memory_space<vmem>>, vector<8x32xf32>
      %c0_23 = arith.constant 0 : index
      %c0_24 = arith.constant 0 : index
      %50 = vector.load %arg8[%c0_23, %c0_24] : memref<8x32xf32, #tpu.memory_space<vmem>>, vector<8x32xf32>
      tpu.vector_store %arg8[%c0_23, %c0_24], %49 {strides = array<i32>} : memref<8x32xf32, #tpu.memory_space<vmem>>, vector<8x32xf32>,
      %c0_25 = arith.constant 0 : index
      %c32 = arith.constant 32 : index
      %51 = vector.load %arg2[%c0_25, %c32] : memref<8x64xf32, #tpu.memory_space<vmem>>, vector<8x32xf32>
      %c0_26 = arith.constant 0 : index
      %c0_27 = arith.constant 0 : index
      %52 = vector.load %arg9[%c0_26, %c0_27] : memref<8x32xf32, #tpu.memory_space<vmem>>, vector<8x32xf32>
      tpu.vector_store %arg9[%c0_26, %c0_27], %51 {strides = array<i32>} : memref<8x32xf32, #tpu.memory_space<vmem>>, vector<8x32xf32>,
    } else {
    }
    %c0 = arith.constant 0 : index
    %c0_1 = arith.constant 0 : index
    %3 = vector.load %arg4[%c0, %c0_1] : memref<64x128xbf16, #tpu.memory_space<vmem>>, vector<64x128xbf16>
    %c0_2 = arith.constant 0 : index
    %c0_3 = arith.constant 0 : index
    %4 = vector.load %arg5[%c0_2, %c0_3] : memref<1x128xf32, #tpu.memory_space<vmem>>, vector<1x128xf32>
    %5 = vector.shape_cast %4 : vector<1x128xf32> to vector<1x128xf32>
    %6 = vector.broadcast %5 : vector<1x128xf32> to vector<8x128xf32>
    %7 = tpu.iota {dimensions = array<i32: 1>} : vector<8x128xi32>
    %c64_i32 = arith.constant 64 : i32
    %8 = vector.broadcast %c64_i32 : i32 to vector<8x128xi32>
    %9 = arith.cmpi sge, %7, %8 : vector<8x128xi32>
    %c96_i32 = arith.constant 96 : i32
    %10 = vector.broadcast %c96_i32 : i32 to vector<8x128xi32>
    %11 = arith.cmpi slt, %7, %10 : vector<8x128xi32>
    %12 = arith.andi %9, %11 : vector<8x128xi1>
    %cst = arith.constant 0.000000e+00 : f32
    %13 = vector.broadcast %cst : f32 to vector<8x96xf32>
    %c0_i32_4 = arith.constant 0 : i32
    %c0_5 = arith.constant 0 : index
    %c0_6 = arith.constant 0 : index
    %14 = vector.load %arg8[%c0_5, %c0_6] : memref<8x32xf32, #tpu.memory_space<vmem>>, vector<8x32xf32>
    %c0_7 = arith.constant 0 : index
    %c0_8 = arith.constant 0 : index
    %15 = vector.load %arg9[%c0_7, %c0_8] : memref<8x32xf32, #tpu.memory_space<vmem>>, vector<8x32xf32>
    %16 = arith.index_cast %c0_i32_4 : i32 to index
    %c0_9 = arith.constant 0 : index
    %c0_10 = arith.constant 0 : index
    %17 = vector.load %arg3[%16, %c0_9, %c0_10] : memref<1x8x32xbf16, #tpu.memory_space<vmem>>, vector<1x8x32xbf16>
    %18 = vector.shape_cast %17 : vector<1x8x32xbf16> to vector<8x32xbf16>
    %19 = arith.truncf %14 : vector<8x32xf32> to vector<8x32xbf16>
    %20 = tpu.concatenate %18, %19 in 1 : vector<8x32xbf16>, vector<8x32xbf16> -> vector<8x64xbf16>
    %cst_11 = arith.constant dense<0.000000e+00> : vector<8x128xf32>
    %21 = tpu.matmul %20, %3, %cst_11 {dimension_numbers = #tpu.dot_dimension_numbers<[1], [0], [0], [1], [0, 0, 1, 1], [], []>} : vector<8x64xbf16>, vector<64x128xbf16>, vector<8x128xf32> -> vector<8x128xf32>
    %22 = arith.addf %21, %6 : vector<8x128xf32>
    %23 = math.tanh %22 : vector<8x128xf32>
    %24 = arith.negf %22 : vector<8x128xf32>
    %25 = math.exp %24 : vector<8x128xf32>
    %cst_12 = arith.constant 1.000000e+00 : f32
    %26 = vector.broadcast %cst_12 : f32 to vector<8x128xf32>
    %27 = arith.addf %26, %25 : vector<8x128xf32>
    %28 = arith.divf %26, %27 : vector<8x128xf32>
    %29 = arith.select %12, %23, %28 : vector<8x128xi1>, vector<8x128xf32>
    %30 = vector.extract_strided_slice %29 {offsets = [0, 0], sizes = [8, 32], strides = [1, 1]} : vector<8x128xf32> to vector<8x32xf32>
    %31 = vector.extract_strided_slice %29 {offsets = [0, 32], sizes = [8, 32], strides = [1, 1]} : vector<8x128xf32> to vector<8x32xf32>
    %32 = vector.extract_strided_slice %29 {offsets = [0, 64], sizes = [8, 32], strides = [1, 1]} : vector<8x128xf32> to vector<8x32xf32>
    %33 = vector.extract_strided_slice %29 {offsets = [0, 96], sizes = [8, 32], strides = [1, 1]} : vector<8x128xf32> to vector<8x32xf32>
    %34 = arith.mulf %31, %15 : vector<8x32xf32>
    %35 = arith.mulf %30, %32 : vector<8x32xf32>
    %36 = arith.addf %34, %35 : vector<8x32xf32>
    %37 = math.tanh %36 : vector<8x32xf32>
    %38 = arith.mulf %33, %37 : vector<8x32xf32>
    %c0_13 = arith.constant 0 : index
    %c0_14 = arith.constant 0 : index
    %39 = vector.load %arg8[%c0_13, %c0_14] : memref<8x32xf32, #tpu.memory_space<vmem>>, vector<8x32xf32>
    tpu.vector_store %arg8[%c0_13, %c0_14], %38 {strides = array<i32>} : memref<8x32xf32, #tpu.memory_space<vmem>>, vector<8x32xf32>,
    %c0_15 = arith.constant 0 : index
    %c0_16 = arith.constant 0 : index
    %40 = vector.load %arg9[%c0_15, %c0_16] : memref<8x32xf32, #tpu.memory_space<vmem>>, vector<8x32xf32>
    tpu.vector_store %arg9[%c0_15, %c0_16], %36 {strides = array<i32>} : memref<8x32xf32, #tpu.memory_space<vmem>>, vector<8x32xf32>,
    %41 = tpu.concatenate %38, %13 in 1 : vector<8x32xf32>, vector<8x96xf32> -> vector<8x128xf32>
    %42 = arith.index_cast %c0_i32_4 : i32 to index
    %c0_17 = arith.constant 0 : index
    %c0_18 = arith.constant 0 : index
    %43 = vector.load %arg6[%42, %c0_17, %c0_18] : memref<1x8x128xf32, #tpu.memory_space<vmem>>, vector<1x8x128xf32>
    %44 = vector.shape_cast %43 : vector<1x8x128xf32> to vector<8x128xf32>
    %45 = vector.shape_cast %41 : vector<8x128xf32> to vector<1x8x128xf32>
    tpu.vector_store %arg6[%42, %c0_17, %c0_18], %45 {strides = array<i32>} : memref<1x8x128xf32, #tpu.memory_space<vmem>>, vector<1x8x128xf32>,
    %c1_i32 = arith.constant 1 : i32
    %c0_i32_19 = arith.constant 0 : i32
    %46 = arith.cmpi eq, %arg1, %c0_i32_19 : i32
    %47 = arith.extui %46 : i1 to i32
    %c0_i32_20 = arith.constant 0 : i32
    %48 = arith.cmpi ne, %47, %c0_i32_20 : i32
    scf.if %48 {
      %c0_21 = arith.constant 0 : index
      %c0_22 = arith.constant 0 : index
      %49 = vector.load %arg8[%c0_21, %c0_22] : memref<8x32xf32, #tpu.memory_space<vmem>>, vector<8x32xf32>
      %c0_23 = arith.constant 0 : index
      %c0_24 = arith.constant 0 : index
      %50 = vector.load %arg9[%c0_23, %c0_24] : memref<8x32xf32, #tpu.memory_space<vmem>>, vector<8x32xf32>
      %51 = tpu.concatenate %49, %50 in 1 : vector<8x32xf32>, vector<8x32xf32> -> vector<8x64xf32>
      %c0_25 = arith.constant 0 : index
      %c0_26 = arith.constant 0 : index
      %52 = vector.load %arg7[%c0_25, %c0_26] : memref<8x64xf32, #tpu.memory_space<vmem>>, vector<8x64xf32>
      tpu.vector_store %arg7[%c0_25, %c0_26], %51 {strides = array<i32>} : memref<8x64xf32, #tpu.memory_space<vmem>>, vector<8x64xf32>,
    } else {
    }
    return
  }
  func.func @transform_0(%arg0: i32, %arg1: i32) -> (i32, i32) {
    %c0_i32 = arith.constant 0 : i32
    %c0_i32_0 = arith.constant 0 : i32
    return %arg0, %c0_i32 : i32, i32
  }
  func.func @transform_1(%arg0: i32, %arg1: i32) -> (i32, i32, i32) {
    %c0_i32 = arith.constant 0 : i32
    %c0_i32_0 = arith.constant 0 : i32
    return %arg1, %arg0, %c0_i32 : i32, i32, i32
  }
  func.func @transform_2(%arg0: i32, %arg1: i32) -> (i32, i32) {
    %c0_i32 = arith.constant 0 : i32
    %c0_i32_0 = arith.constant 0 : i32
    %c0_i32_1 = arith.constant 0 : i32
    return %c0_i32, %c0_i32_0 : i32, i32
  }
  func.func @transform_3(%arg0: i32, %arg1: i32) -> (i32, i32) {
    %c0_i32 = arith.constant 0 : i32
    %c0_i32_0 = arith.constant 0 : i32
    %c0_i32_1 = arith.constant 0 : i32
    return %c0_i32, %c0_i32_0 : i32, i32
  }
  func.func @transform_4(%arg0: i32, %arg1: i32) -> (i32, i32, i32) {
    %c0_i32 = arith.constant 0 : i32
    %c0_i32_0 = arith.constant 0 : i32
    return %arg1, %arg0, %c0_i32 : i32, i32, i32
  }
  func.func @transform_5(%arg0: i32, %arg1: i32) -> (i32, i32) {
    %c0_i32 = arith.constant 0 : i32
    %c0_i32_0 = arith.constant 0 : i32
    return %arg0, %c0_i32 : i32, i32
  }
}

</mosaic_0001>

<bundles_post_ra>
// kernel: step_fn.1
= control target key start
LH: loop header
LB: loop body
LE: loop exit
PB: predicated region body
PF: predicated region fallthrough
CT: control target
= control target key end

     0   :  { %vm25_vm0 = vcmask 261120   ;;  %v232_v1 = vmov 0.0   ;;  %vm233_vm1 = vmmov 0   ;;  %s235_s28 = smov 96   ;;  %vm88_vm2 = vcmask 523264   ;;  %s310_s0 = inlined_call_operand.vmem [shape: f32[8,64], index: 0, kind: input, shape index: {}]   ;;  %s311_s2 = inlined_call_operand.vmem [shape: bf16[64,128], index: 2, kind: input, shape index: {}]   ;;  %s312_s1 = inlined_call_operand.vmem [shape: bf16[1,8,32], index: 1, kind: input, shape index: {}]   ;;  %s313_s3 = inlined_call_operand.vmem [shape: f32[1,128], index: 3, kind: input, shape index: {}]   ;;  %s314_s4 = inlined_call_operand.vmem [shape: f32[1,8,128], index: 4, kind: output, shape index: {0}]   ;;  %s315_s5 = inlined_call_operand.vmem [shape: f32[8,64], index: 5, kind: output, shape index: {1}]  }
   0x1   :  { %v24_v0 = vld [vmem:[%s310_s0] sm:$0xff]  ;;  %203 = vmatprep.subr.bf16.mxu0 %v232_v1  ;;  %211 = vmatprep.mubr.msk.bf16.mxu0 %vm233_vm1, %v232_v1  ;;  %v221_v3 = vld [vmem:[%s311_s2 + $0x8] sm:$0xff]   ;;  %v222_v4 = vld [vmem:[%s311_s2 + $0x10] sm:$0xff]   ;;  %s234_s0 = smov 32   ;;  %v48_v20 = vlaneseq }
   0x2   :  { %26 = vst.msk [vmem:[#allocation2] sm:$0xff] %vm25_vm0, %v24_v0  ;;  %v220_v2 = vld [vmem:[%s311_s2] sm:$0xff]   ;;  %v223_v7 = vld [vmem:[%s311_s2 + $0x18] sm:$0xff]  }
   0x3   :  { %204 = vmatpush3.bf16.msra.mxu0 %v220_v2  ;;  %v55_v8 = vld [vmem:[%s312_s1] sm:$0xf]  ;;  %v49_v22 = vand.u32 127, %v48_v20  ;;  %s236_s1 = smov 64  }
   0x4   :  { %205 = vmatprep.subr.bf16.mxu0 %v232_v1  ;;  %v191_v12 = vld [vmem:[%s313_s3] ss:$0 sm:$0xff] }
   0x5   :  { %vm50_vm3 = vcmp.ge.s32.totalorder %v49_v22, 64  ;;  %vm51_vm4 = vcmp.lt.s32.totalorder %v49_v22, 96 }
   0x6   :  { %vm52_vm5 = vmand %vm50_vm3, %vm51_vm4 }
   0x7   :  { %206 = vmatpush3.bf16.msra.mxu0 %v221_v3 }
   0x8   :  { %207 = vmatprep.subr.bf16.mxu0 %v232_v1 }
   0x9   :  { %v53_v5 = vld [vmem:[#allocation2] sm:$0xff] }
   0xa   :  { %v56_v6 = vpack.c.bf16 %v53_v5, %v53_v5 }
   0xb   :  { %208 = vmatpush3.bf16.msra.mxu0 %v222_v4 }
   0xc   :  { %58 = vrot.lane.b32.xlu0 %v56_v6, %s234_s0  ;;  %209 = vmatprep.subr.bf16.mxu0 %v232_v1 }
   0xf   :  { %210 = vmatpush3.bf16.msra.mxu0 %v223_v7 }
  0x10   :  { %29 = vrot.lane.b32.xlu0 %v24_v0, %s235_s28 }
  0x7e   :  { %v59_v9 = vpop.permute.xlu0 %58 }
  0x7f   :  { %v63_v10 = vsel %vm25_vm0, %v55_v8, %v59_v9 }
  0x80   :  { %212 = vmatmul.mubr.msk.bf16.vlgmr.msra.gmra.mrb[0].mxu0 %vm88_vm2, %v63_v10 }
  0x82   :  { %v30_v11 = vpop.permute.xlu0 %29 }
  0x83   :  { %32 = vst.msk [vmem:[#allocation3] sm:$0xff] %vm25_vm0, %v30_v11 }
  0x8a   :  { %v54_v26 = vld [vmem:[#allocation3] sm:$0xff] }
 0x153   :  { %v125_v13 = vpop.f32.mrb[0].mxu0 }
 0x154   :  { %v126_v14 = vadd.f32 %v191_v12, %v125_v13  ;;  %v213_v15 = vpop.f32.mrb[1].mxu0 }
 0x155   :  { %v128_v16 = vpop.f32.mrb[2].mxu0 }
 0x156   :  { %v197_v17 = vmul.f32 -1.442695, %v126_v14  ;;  %v214_v18 = vpop.f32.mrb[3].mxu0 }
 0x158   :  { %224 = vpow2.f32 %v197_v17 }
 0x159   :  { %226 = vtanh.f32 %v126_v14 }
 0x162   :  { %v225_v19 = vpop.eup %224 }
 0x163   :  { %v135_v21 = vadd.f32 1.0, %v225_v19  ;;  %v227_v23 = vpop.eup %226 }
 0x165   :  { %228 = vrcp.f32 %v135_v21 }
 0x16f   :  { %v229_v24 = vpop.eup %228 }
 0x170   :  { %v138_v25 = vsel %vm52_vm5, %v227_v23, %v229_v24 }
 0x171   :  { %145 = vrot.lane.b32.xlu1 %v138_v25, %s236_s1 }
 0x175   :  { %140 = vrot.lane.b32.xlu1 %v54_v26, %s234_s0 }
 0x1e3   :  { %v146_v27 = vpop.permute.xlu1 %145 }
 0x1e4   :  { %v148_v28 = vmul.f32 %v146_v27, %v138_v25 }
 0x1e6   :  { %150 = vrot.lane.b32.xlu0 %v148_v28, %s234_s0 }
 0x1e7   :  { %v141_v29 = vpop.permute.xlu1 %140 }
 0x1e8   :  { %v143_v30 = vmul.f32 %v141_v29, %v138_v25 }
 0x258   :  { %v151_v31 = vpop.permute.xlu0 %150 }
 0x259   :  { %v153_v32 = vadd.f32 %v151_v31, %v143_v30 }
 0x25b   :  { %230 = vtanh.f32 %v153_v32  ;;  %166 = vrot.lane.b32.xlu0 %v153_v32, %s235_s28 }
 0x265   :  { %v231_v33 = vpop.eup %230 }
 0x266   :  { %156 = vrot.lane.b32.xlu1 %v231_v33, %s236_s1 }
 0x2cd   :  { %v167_v34 = vpop.permute.xlu0 %166 }
 0x2ce   :  { %169 = vst.msk [vmem:[#allocation3] sm:$0xff] %vm25_vm0, %v167_v34 }
 0x2d5   :  { %v176_v35 = vld [vmem:[#allocation3] sm:$0xff] }
 0x2d6   :  { %178 = vrot.lane.b32.xlu0 %v176_v35, %s234_s0 }
 0x2d8   :  { %v157_v36 = vpop.permute.xlu1 %156 }
 0x2d9   :  { %v159_v37 = vmul.f32 %v157_v36, %v138_v25 }
 0x2db   :  { %161 = vrot.lane.b32.xlu1 %v159_v37, %s234_s0 }
 0x348   :  { %v179_v40 = vpop.permute.xlu0 %178 }
 0x34d   :  { %v162_v38 = vpop.permute.xlu1 %161 }
 0x34e   :  { %164 = vst.msk [vmem:[#allocation2] sm:$0xff] %vm25_vm0, %v162_v38  ;;  %v170_v39 = vsel %vm25_vm0, %v162_v38, 0.0 }
 0x34f   :  { %171 = vst [vmem:[%s314_s4] sm:$0xff] %v170_v39 }
 0x355   :  { %v175_v41 = vld [vmem:[#allocation2] sm:$0xff] }
 0x356   :  { %v181_v42 = vsel %vm25_vm0, %v175_v41, %v179_v40 }
 0x357   :  { %182 = vst.msk [vmem:[%s315_s5] sm:$0xff] %vm88_vm2, %v181_v42 }

</bundles_post_ra>
